<compile_context>
chip_gen: v7x
topology: tpu7x:2x2x1
jax: 0.10.0
libtpu: 0.0.40
codegen_flags: <defaults>
</compile_context>

<pallas_src>
import math

import jax
import jax.numpy as jnp
from jax import lax
from jax.experimental import pallas as pl
from jax.experimental.pallas import tpu as pltpu


def _vmem_limit_bytes():
    """Generation-aware scoped-VMEM limit (~half of physical capacity)."""
    cap = 64 << 20
    try:
        info = pltpu.get_tpu_info()
        cap = int(getattr(info, "vmem_capacity_bytes", cap)) or cap
    except Exception:
        pass
    return max(cap // 2, 16 << 20)


def _pick_token_tile(n, row_bytes, budget):
    """Token tile from a VMEM byte budget (row_bytes includes double-buffering)."""
    tok = budget // max(row_bytes, 1)
    cap = max(8, (n // 8) * 8) if n >= 8 else 8
    tok = max(8, min(tok, 1024, cap))
    return (tok // 8) * 8


def _pick_group_block(n_group, di, do):
    """Groups fused per block-diagonal matmul step.

    gb is picked so that gb*DO (output lanes) lands near 128-256 and so that
    non-full column strips stay 128-aligned (legal BlockSpec, >=512 B bursts).
    """
    if n_group * di <= 256 and n_group * do <= 256:
        return n_group                      # whole feature dim already small
    best = None
    for gb in range(1, n_group + 1):
        if n_group % gb:
            continue
        full = gb == n_group
        if not full and ((gb * di) % 128 or (gb * do) % 128):
            continue                        # keep partial strips 128-aligned
        w_out, w_in = gb * do, gb * di
        score = (0 if 128 <= w_out <= 256 else 1, max(w_out, w_in), w_out + w_in)
        if best is None or score < best[0]:
            best = (score, gb)
    # TODO(synk): configs with no 128-aligned divisor fall back to full fusion
    #             (wide block-diag -> some wasted MXU FLOPs, still correct).
    return best[1]


# ---------------------------------------------------------------------------
# Kernel 1: sum((a - b)^2), tiled over tokens, per-tile lane-dense partials.
# ---------------------------------------------------------------------------
def _sum_sq_diff(a2, b2, vmem_limit):
    n, d = a2.shape
    itemsize = max(a2.dtype.itemsize, b2.dtype.itemsize)
    row_bytes = 2 * d * itemsize * 2               # two operands, double-buffered
    tok = _pick_token_tile(n, row_bytes, vmem_limit // 2)
    num_tt = -(-n // tok)
    ragged = num_tt * tok != n

    def kernel(a_ref, b_ref, out_ref):
        t = pl.program_id(0)
        diff = a_ref[...].astype(jnp.float32) - b_ref[...].astype(jnp.float32)
        if ragged:
            row = t * tok + lax.broadcasted_iota(jnp.int32, diff.shape, 0)
            diff = jnp.where(row < n, diff, 0.0)
        partial = jnp.sum(diff * diff)
        out_ref[...] = jnp.broadcast_to(partial, (1, 128))

    out = pl.pallas_call(
        kernel,
        out_shape=jax.ShapeDtypeStruct((1, num_tt * 128), jnp.float32),
        grid_spec=pltpu.PrefetchScalarGridSpec(
            num_scalar_prefetch=0,
            grid=(num_tt,),
            in_specs=[
                pl.BlockSpec((tok, d), lambda t: (t, 0)),
                pl.BlockSpec((tok, d), lambda t: (t, 0)),
            ],
            out_specs=pl.BlockSpec((1, 128), lambda t: (0, t)),
        ),
        compiler_params=pltpu.CompilerParams(
            dimension_semantics=("parallel",),
            vmem_limit_bytes=vmem_limit),
    )(a2, b2)
    return jnp.sum(out.reshape(num_tt, 128)[:, 0])


# ---------------------------------------------------------------------------
# Kernel 2: sum((tea_g @ W_g - stu_g)^2); grid = (token tiles, group blocks).
# ---------------------------------------------------------------------------
def _proj_sum_sq_diff(tea2, stu2, weight, n_group, di, do, vmem_limit):
    n = tea2.shape[0]
    gb = _pick_group_block(n_group, di, do)
    num_gb = n_group // gb
    in_w, out_w = gb * di, gb * do

    itemsize = max(tea2.dtype.itemsize, stu2.dtype.itemsize)
    row_bytes = (in_w + out_w) * itemsize * 2 + out_w * 4   # dbl-buf inputs + acc
    tok = _pick_token_tile(n, row_bytes, vmem_limit // 2)
    num_tt = -(-n // tok)
    ragged = num_tt * tok != n

    # Compact bf16 weight, VMEM-resident (constant index_map -> single DMA).
    w_c = weight.astype(jnp.bfloat16).reshape(num_gb, in_w, do)
    # 0/1 block-diagonal mask used to assemble the (in_w, out_w) tile in-kernel.
    row_grp = jnp.arange(in_w, dtype=jnp.int32) // di
    col_grp = jnp.arange(out_w, dtype=jnp.int32) // do
    bd_mask = (row_grp[:, None] == col_grp[None, :]).astype(jnp.bfloat16)

    def kernel(tea_ref, stu_ref, w_ref, m_ref, out_ref, acc_ref):
        t = pl.program_id(0)
        g = pl.program_id(1)

        @pl.when(g == 0)
        def _init():
            acc_ref[...] = jnp.zeros_like(acc_ref)

        w_blk = w_ref[g]                                       # (in_w, do) bf16
        if gb == 1:
            wbd = w_blk
        else:
            wbd = jnp.concatenate([w_blk] * gb, axis=1) * m_ref[...]
        proj = jnp.dot(tea_ref[...].astype(jnp.bfloat16), wbd,
                       preferred_element_type=jnp.float32)     # (tok, out_w) f32
        diff = proj - stu_ref[...].astype(jnp.float32)
        acc_ref[...] += diff * diff                            # VPU adds only

        @pl.when(g == num_gb - 1)
        def _finalize():
            acc = acc_ref[...]
            if ragged:
                row = t * tok + lax.broadcasted_iota(jnp.int32, acc.shape, 0)
                acc = jnp.where(row < n, acc, 0.0)
            partial = jnp.sum(acc)                             # once per tile
            out_ref[...] = jnp.broadcast_to(partial, (1, 128))

    out = pl.pallas_call(
        kernel,
        out_shape=jax.ShapeDtypeStruct((1, num_tt * 128), jnp.float32),
        grid_spec=pltpu.PrefetchScalarGridSpec(
            num_scalar_prefetch=0,
            grid=(num_tt, num_gb),            # token axis outer ("parallel")
            in_specs=[
                pl.BlockSpec((tok, in_w), lambda t, g: (t, g)),
                pl.BlockSpec((tok, out_w), lambda t, g: (t, g)),
                pl.BlockSpec((num_gb, in_w, do), lambda t, g: (0, 0, 0)),
                pl.BlockSpec((in_w, out_w), lambda t, g: (0, 0)),
            ],
            out_specs=pl.BlockSpec((1, 128), lambda t, g: (0, t)),
            scratch_shapes=[pltpu.VMEM((tok, out_w), jnp.float32)],
        ),
        compiler_params=pltpu.CompilerParams(
            dimension_semantics=("parallel", "arbitrary"),
            vmem_limit_bytes=vmem_limit),
    )(tea2, stu2, w_c, bd_mask)
    return jnp.sum(out.reshape(num_tt, 128)[:, 0])


# ---------------------------------------------------------------------------
# Wrapper: mirrors MultiGroupDistillation.forward.
# ---------------------------------------------------------------------------
def multi_group_distillation(stu_q, tea_q, stu_fup, tea_fup, weight,
                             n_group, group_in_dim, group_out_dim,
                             beta=0.0, gamma=2.0):
    bsz, seq = tea_fup.shape[0], tea_fup.shape[1]
    N = bsz * seq
    vmem_limit = _vmem_limit_bytes()

    loss = jnp.float32(0.0)

    # beta * MSE(stu_quantized, tea_quantized): gated at trace time.
    if beta != 0.0:
        q_sum = _sum_sq_diff(stu_q.reshape(N, -1), tea_q.reshape(N, -1),
                             vmem_limit)
        loss = loss + beta * q_sum / float(stu_q.size)

    need_project = group_in_dim != group_out_dim
    stu2 = stu_fup.reshape(N, -1)
    tea2 = tea_fup.reshape(N, -1)

    if not need_project:
        fup_sum = _sum_sq_diff(stu2, tea2, vmem_limit)
    else:
        fup_sum = _proj_sum_sq_diff(tea2, stu2, weight, n_group,
                                    group_in_dim, group_out_dim, vmem_limit)
    return loss + gamma * fup_sum / float(stu_fup.size)


if __name__ == "__main__":
    key = jax.random.PRNGKey(0)
    k = jax.random.split(key, 12)

    def reference(stu_q, tea_q, stu_fup, tea_fup, weight, n_group, di, do,
                  beta, gamma):
        loss = 0.0
        if beta != 0.0:
            loss = beta * jnp.mean((stu_q - tea_q) ** 2)
        if di != do:
            bsz, seq = tea_fup.shape[:2]
            tv = tea_fup.reshape(bsz, seq, n_group, di).transpose(0, 2, 1, 3)
            w3 = weight.reshape(n_group, di, do)
            tl = jnp.einsum("bgsd,gde->bgse", tv, w3)
            tl = tl.transpose(0, 2, 1, 3).reshape(bsz, seq, -1)
            return loss + gamma * jnp.mean((stu_fup - tl) ** 2)
        return loss + gamma * jnp.mean((stu_fup - tea_fup) ** 2)

    # ------------- case 1: need_project, full fusion, beta != 0 -------------
    bsz, seq = 2, 8
    n_group, di, do = 4, 16, 32
    dq = n_group * do
    stu_q = jax.random.normal(k[0], (bsz, seq, dq), jnp.float32)
    tea_q = jax.random.normal(k[1], (bsz, seq, dq), jnp.float32)
    stu_fup = jax.random.normal(k[2], (bsz, seq, n_group * do), jnp.float32)
    tea_fup = jax.random.normal(k[3], (bsz, seq, n_group * di), jnp.float32)
    bound = 1.0 / math.sqrt(do)  # kaiming_uniform_(a=sqrt(5)), fan_in = do
    weight = jax.random.uniform(k[4], (n_group * di, do), jnp.float32,
                                minval=-bound, maxval=bound)
    beta, gamma = 0.5, 2.0
    loss1 = jax.block_until_ready(multi_group_distillation(
        stu_q, tea_q, stu_fup, tea_fup, weight, n_group, di, do, beta, gamma))
    ref1 = reference(stu_q, tea_q, stu_fup, tea_fup, weight, n_group, di, do,
                     beta, gamma)
    # bf16 MXU operands (f32 accumulation) -> loosened tolerance for proj term.
    assert jnp.allclose(loss1, ref1, rtol=2e-2, atol=2e-3), (loss1, ref1)

    # ------------- case 2: no projection (DI == DO), beta = 0 ---------------
    stu_fup2 = jax.random.normal(k[5], (bsz, seq, n_group * 32), jnp.float32)
    tea_fup2 = jax.random.normal(k[6], (bsz, seq, n_group * 32), jnp.float32)
    loss2 = jax.block_until_ready(multi_group_distillation(
        stu_q, tea_q, stu_fup2, tea_fup2, None, n_group, 32, 32, 0.0, gamma))
    ref2 = gamma * jnp.mean((stu_fup2 - tea_fup2) ** 2)
    assert jnp.allclose(loss2, ref2, rtol=1e-4, atol=1e-5), (loss2, ref2)

    # ------- case 3: ragged N (tail masking) + multiple group blocks --------
    bsz3, seq3 = 3, 7                 # N = 21: exercises tail-row masking
    ng3, di3, do3 = 16, 16, 32        # -> gb = 8, num_gb = 2
    dq3 = ng3 * do3
    stu_q3 = jax.random.normal(k[7], (bsz3, seq3, dq3), jnp.float32)
    tea_q3 = jax.random.normal(k[8], (bsz3, seq3, dq3), jnp.float32)
    stu_fup3 = jax.random.normal(k[9], (bsz3, seq3, ng3 * do3), jnp.float32)
    tea_fup3 = jax.random.normal(k[10], (bsz3, seq3, ng3 * di3), jnp.float32)
    bound3 = 1.0 / math.sqrt(do3)
    weight3 = jax.random.uniform(k[11], (ng3 * di3, do3), jnp.float32,
                                 minval=-bound3, maxval=bound3)
    loss3 = jax.block_until_ready(multi_group_distillation(
        stu_q3, tea_q3, stu_fup3, tea_fup3, weight3, ng3, di3, do3, 0.3, gamma))
    ref3 = reference(stu_q3, tea_q3, stu_fup3, tea_fup3, weight3, ng3, di3, do3,
                     0.3, gamma)
    assert jnp.allclose(loss3, ref3, rtol=2e-2, atol=2e-3), (loss3, ref3)

    print("KERNEL_OK")
</pallas_src>

<mosaic_0001>
module attributes {stable_mosaic.version = 11 : i64} {
  func.func @kernel(%arg0: i32, %arg1: memref<16x128xf32, #tpu.memory_space<vmem>>, %arg2: memref<16x128xf32, #tpu.memory_space<vmem>>, %arg3: memref<1x128xf32, #tpu.memory_space<vmem>>) attributes {dimension_semantics = [#tpu.dimension_semantics<parallel>], iteration_bounds = array<i64: 1>, scalar_prefetch = 0 : i64, scratch_operands = 0 : i64, tpu.core_type = #tpu.core_type<tc>, window_params = [{transform_indices = @transform_0, window_bounds = array<i64: 16, 128>}, {transform_indices = @transform_1, window_bounds = array<i64: 16, 128>}, {transform_indices = @transform_2, window_bounds = array<i64: 1, 128>}]} {
    %c0 = arith.constant 0 : index
    %c0_0 = arith.constant 0 : index
    %0 = vector.load %arg1[%c0, %c0_0] : memref<16x128xf32, #tpu.memory_space<vmem>>, vector<16x128xf32>
    %c0_1 = arith.constant 0 : index
    %c0_2 = arith.constant 0 : index
    %1 = vector.load %arg2[%c0_1, %c0_2] : memref<16x128xf32, #tpu.memory_space<vmem>>, vector<16x128xf32>
    %2 = arith.subf %0, %1 : vector<16x128xf32>
    %3 = arith.mulf %2, %2 : vector<16x128xf32>
    %4 = vector.shape_cast %3 : vector<16x128xf32> to vector<1x16x128xf32>
    %cst = arith.constant dense<0.000000e+00> : vector<1xf32>
    %5 = vector.multi_reduction <add>, %4, %cst [1, 2] : vector<1x16x128xf32> to vector<1xf32>
    %6 = vector.shape_cast %5 : vector<1xf32> to vector<1x1x1xf32>
    %7 = vector.extract %6[0, 0, 0] : f32 from vector<1x1x1xf32>
    %8 = vector.broadcast %7 : f32 to vector<1x128xf32>
    %c0_3 = arith.constant 0 : index
    %c0_4 = arith.constant 0 : index
    %9 = vector.load %arg3[%c0_3, %c0_4] : memref<1x128xf32, #tpu.memory_space<vmem>>, vector<1x128xf32>
    tpu.vector_store %arg3[%c0_3, %c0_4], %8 {strides = array<i32>} : memref<1x128xf32, #tpu.memory_space<vmem>>, vector<1x128xf32>,
    return
  }
  func.func @transform_0(%arg0: i32) -> (i32, i32) {
    %c0_i32 = arith.constant 0 : i32
    %c0_i32_0 = arith.constant 0 : i32
    return %arg0, %c0_i32 : i32, i32
  }
  func.func @transform_1(%arg0: i32) -> (i32, i32) {
    %c0_i32 = arith.constant 0 : i32
    %c0_i32_0 = arith.constant 0 : i32
    return %arg0, %c0_i32 : i32, i32
  }
  func.func @transform_2(%arg0: i32) -> (i32, i32) {
    %c0_i32 = arith.constant 0 : i32
    %c0_i32_0 = arith.constant 0 : i32
    return %c0_i32, %arg0 : i32, i32
  }
}

</mosaic_0001>

<bundles_post_ra>
// kernel: tpu_custom_call.1
= control target key start
LH: loop header
LB: loop body
LE: loop exit
PB: predicated region body
PF: predicated region fallthrough
CT: control target
= control target key end

     0   :  { %7 = vsyncpa [#allocation3], 0  ;;  %s211_s0 = inlined_call_operand.hbm [shape: f32[16,128], index: 0, kind: input, shape index: {}]   ;;  %s212_s1 = inlined_call_operand.hbm [shape: f32[16,128], index: 1, kind: input, shape index: {}]   ;;  %s213_s2 = inlined_call_operand.hbm [shape: f32[1,128], index: 2, kind: output, shape index: {}]  }
   0x1   :  { %8 = vsyncpa [#allocation6], 0 }
   0x2   :  { %9 = vsyncpa [#allocation4], 0  ;;  %s155_s9 = smov [#allocation2]   ;;  %s83_s13 = scalar_lea.hbm %s211_s0, 256 }
   0x3   :  { %s15_s10 = sshll.u32 %s155_s9, 4  ;;  %p84_p0 = scmp.ne.s32.totalorder %s211_s0, %s83_s13  ;;  %s16_s10 = int_to_ptr.vmem [resolvable:$true] %s15_s10 }
   0x4   :  { %p87_p1 = scmp.lt.u32.totalorder %s83_s13, %s211_s0 }
   0x6   :  { %p89_p2 = pnand %p87_p1, %p84_p0 }
   0x8   :  { %92 = shalt.err (!%p89_p2)
}
   0x9   :  { %s93_s18 = scalar_lea.vmem %s16_s10, 256  ;;  %p98_p4 = scmp.lt.s32.totalorder %s16_s10, %s16_s10 }
   0xa   :  { %p94_p3 = scmp.ne.s32.totalorder %s16_s10, %s93_s18  ;;  %p99_p5 = scmp.lt.s32.totalorder %s93_s18, %s93_s18 }
   0xc   :  { %p100_p6 = por %p99_p5, %p98_p4 }
   0xe   :  { %p101_p7 = pnand %p100_p6, %p94_p3 }
  0x10   :  { %104 = shalt.err (!%p101_p7)
}
  0x11   :  { %s156_s19 = smov 128   ;;  %s157_s20 = smov 8  }
  0x12   :  { %21 = dma.hbm_to_vmem [thread:$0]  %s211_s0, 256, %s16_s10, [#allocation3], %s156_s19, %s156_s19, %s157_s20  }
  0x13   :  { %s158_s23 = smov [#allocation5]   ;;  %s105_s27 = scalar_lea.hbm %s212_s1, 256 }
  0x14   :  { %s27_s24 = sshll.u32 %s158_s23, 4  ;;  %p106_p8 = scmp.ne.s32.totalorder %s212_s1, %s105_s27  ;;  %s28_s24 = int_to_ptr.vmem [resolvable:$true] %s27_s24 }
  0x15   :  { %p109_p9 = scmp.lt.u32.totalorder %s105_s27, %s212_s1 }
  0x17   :  { %p111_p10 = pnand %p109_p9, %p106_p8 }
  0x19   :  { %114 = shalt.err (!%p111_p10)
}
  0x1a   :  { %s115_s4 = scalar_lea.vmem %s28_s24, 256  ;;  %p120_p12 = scmp.lt.s32.totalorder %s28_s24, %s28_s24 }
  0x1b   :  { %p116_p11 = scmp.ne.s32.totalorder %s28_s24, %s115_s4  ;;  %p121_p13 = scmp.lt.s32.totalorder %s115_s4, %s115_s4 }
  0x1d   :  { %p122_p0 = por %p121_p13, %p120_p12 }
  0x1f   :  { %p123_p1 = pnand %p122_p0, %p116_p11 }
  0x21   :  { %126 = shalt.err (!%p123_p1)
}
  0x22   :  { %33 = dma.hbm_to_vmem [thread:$0]  %s212_s1, 256, %s28_s24, [#allocation6], %s156_s19, %s156_s19, %s157_s20  }
  0x23   :  { %149 = dma.done.wait [#allocation3], 256  }
  0x24   :  { %150 = vsyncadd [#allocation3], 4294967040 }
  0x25   :  { %151 = dma.done.wait [#allocation6], 256  }
  0x26   :  { %152 = vsyncadd [#allocation6], 4294967040  ;;  %v40_v0 = vld [vmem:[#allocation2] sm:$0xff]  ;;  %v41_v1 = vld [vmem:[#allocation2 + $0x8] sm:$0xff]  ;;  %s159_s1 = smov [#allocation7]  }
  0x27   :  { %v42_v2 = vld [vmem:[#allocation5] sm:$0xff]  ;;  %v43_v3 = vld [vmem:[#allocation5 + $0x8] sm:$0xff]  ;;  %s66_s6 = sshll.u32 %s159_s1, 4  ;;  %s67_s6 = int_to_ptr.vmem [resolvable:$true] %s66_s6 }
  0x28   :  { %v44_v4 = vsub.f32 %v40_v0, %v42_v2  ;;  %v45_v5 = vsub.f32 %v41_v1, %v43_v3  ;;  %s127_s8 = scalar_lea.vmem %s67_s6, 16  ;;  %s131_s9 = scalar_lea.vmem %s67_s6, 32 }
  0x29   :  { %p128_p2 = scmp.ne.s32.totalorder %s67_s6, %s127_s8  ;;  %p132_p3 = scmp.lt.s32.totalorder %s67_s6, %s67_s6 }
  0x2a   :  { %v46_v6 = vmul.f32 %v44_v4, %v44_v4  ;;  %v47_v7 = vmul.f32 %v45_v5, %v45_v5  ;;  %p133_p4 = scmp.lt.s32.totalorder %s131_s9, %s127_s8 }
  0x2c   :  { %v48_v8 = vadd.f32 %v47_v7, %v46_v6  ;;  %p134_p5 = por %p133_p4, %p132_p3 }
  0x2e   :  { %49 = vadd.xlane.f32.xlu0 %v48_v8  ;;  %p135_p6 = pnand %p134_p5, %p128_p2 }
  0xbb   :  { %v50_v9 = vpop.xlane.xlu0 %49 }
  0xbc   :  { %v51_v10 = vrot.slane %v50_v9, 4 }
  0xbe   :  { %v52_v11 = vadd.f32 %v51_v10, %v50_v9 }
  0xc0   :  { %v53_v12 = vrot.slane %v52_v11, 2 }
  0xc2   :  { %v54_v13 = vadd.f32 %v53_v12, %v52_v11 }
  0xc4   :  { %v55_v14 = vrot.slane %v54_v13, 1 }
  0xc6   :  { %v56_v15 = vadd.f32 %v55_v14, %v54_v13 }
  0xc8   :  { %76 = vpush %v56_v15 }
  0xf9   :  { %s77_s7 = spop %76 }
  0xfa   :  { %v58_v16 = vstv %s77_s7 }
  0xfb   :  { %59 = vst [vmem:[#allocation7] sm:$0x1] %v58_v16 }
  0xfc   :  { %138 = shalt.err (!%p135_p6)
}
  0xfd   :  { %s139_s12 = scalar_lea.hbm %s213_s2, 16 }
  0xfe   :  { %p140_p7 = scmp.ne.s32.totalorder %s213_s2, %s139_s12  ;;  %p143_p8 = scmp.lt.u32.totalorder %s139_s12, %s213_s2 }
 0x100   :  { %p145_p9 = pnand %p143_p8, %p140_p7 }
 0x102   :  { %148 = shalt.err (!%p145_p9)
}
 0x103   :  { %69 = dma.vmem_to_hbm [thread:$0]  %s67_s6, 16, %s213_s2, [#allocation4]  }
 0x104   :  { %153 = dma.done.wait [#allocation4], 16  }
 0x105   :  { %154 = vsyncadd [#allocation4], 4294967280 }
 0x106   :  { %73 = vsyncpa [#allocation3], 1 }
 0x107   :  { %74 = vsyncpa [#allocation6], 1 }
 0x108   :  { %75 = vsyncpa [#allocation4], 1 }

</bundles_post_ra>
